<compile_context>
chip_gen: v6e
topology: v6e:2x2x1
jax: 0.10.0
libtpu: 0.0.40
codegen_flags: <defaults>
</compile_context>

<pallas_src>
from functools import partial

import jax
import jax.numpy as jnp
from jax.experimental import pallas as pl
from jax.experimental.pallas import tpu as pltpu


# ----------------------------------------------------------------------------
# Fused Pallas kernel: the whole ChebNetwork forward.
#   per layer: out = sigmoid( [T_0 | T_1 | ... | T_{K-1}] @ W_stacked + b )
#   T_0 = h, T_1 = L_hat @ h, T_k = 2 * L_hat @ T_{k-1} - T_{k-2}
# ----------------------------------------------------------------------------
def _cheb_network_kernel(num_layers, K, lhat_ref, x_ref, w_ref, b_ref, o_ref):
    L = lhat_ref[...]                  # (N_pad, N_pad) bf16 MXU operand
    h = x_ref[...]                     # (N_pad, F_pad) f32

    for layer in range(num_layers):
        # Chebyshev recurrence (recurrence arithmetic in f32, MXU inputs in bf16).
        t_prev2 = h
        taps = [t_prev2]
        if K > 1:
            t_prev1 = jnp.dot(L, t_prev2.astype(jnp.bfloat16),
                              preferred_element_type=jnp.float32)
            taps.append(t_prev1)
            for _ in range(2, K):
                t_cur = 2.0 * jnp.dot(L, t_prev1.astype(jnp.bfloat16),
                                      preferred_element_type=jnp.float32) - t_prev2
                taps.append(t_cur)
                t_prev2, t_prev1 = t_prev1, t_cur

        # Single wide contraction over K*F_pad instead of K skinny matmuls.
        t_stack = jnp.concatenate(taps, axis=1).astype(jnp.bfloat16)  # (N_pad, K*F_pad)
        w_l = w_ref[layer].astype(jnp.bfloat16)                       # (K*F_pad, F_pad)
        out = jnp.dot(t_stack, w_l, preferred_element_type=jnp.float32)
        out = out + b_ref[layer]                                      # (1, F_pad) broadcast
        h = jax.nn.sigmoid(out)                                       # f32 elementwise

    o_ref[...] = h


def cheb_network_pallas(lhat_bf16, x_pad, w_all, b_all, num_layers, K):
    """One pallas_call for the full layer stack (full-array blocks, grid=(1,))."""
    n_pad = x_pad.shape[0]
    f_pad = x_pad.shape[1]
    kernel = partial(_cheb_network_kernel, num_layers, K)
    return pl.pallas_call(
        kernel,
        out_shape=jax.ShapeDtypeStruct((n_pad, f_pad), jnp.float32),
        grid=(1,),
        in_specs=[
            pl.BlockSpec((n_pad, n_pad), lambda i: (0, 0)),                     # L_hat (bf16)
            pl.BlockSpec((n_pad, f_pad), lambda i: (0, 0)),                     # x (f32, padded)
            pl.BlockSpec((num_layers, K * f_pad, f_pad), lambda i: (0, 0, 0)),  # stacked W
            pl.BlockSpec((num_layers, 1, f_pad), lambda i: (0, 0, 0)),          # stacked bias
        ],
        out_specs=pl.BlockSpec((n_pad, f_pad), lambda i: (0, 0)),
        compiler_params=pltpu.CompilerParams(
            dimension_semantics=("arbitrary",),
        ),
    )(lhat_bf16, x_pad, w_all, b_all)


# ----------------------------------------------------------------------------
# Plain-JAX glue: dense scaled Laplacian (matches ChebConv.__norm__ with
# normalization='sym', lambda_max defaulting to 2.0):
#   L_hat = -D^{-1/2} A D^{-1/2}, diagonal = 0
# propagate() aggregates at the target node, so L_hat[col, row] = norm(edge).
# ----------------------------------------------------------------------------
def build_scaled_laplacian(edge_index, edge_weight, num_nodes):
    row, col = edge_index[0], edge_index[1]
    deg = jnp.zeros((num_nodes,), jnp.float32).at[row].add(edge_weight)
    deg_inv_sqrt = jnp.where(deg > 0, 1.0 / jnp.sqrt(deg), 0.0)
    norm = -deg_inv_sqrt[row] * edge_weight * deg_inv_sqrt[col]
    lhat = jnp.zeros((num_nodes, num_nodes), jnp.float32).at[col, row].add(norm)
    return lhat


def _round_up(v, m):
    return ((v + m - 1) // m) * m


# ----------------------------------------------------------------------------
# ChebNetwork: parameter init + forward (single fused kernel)
# ----------------------------------------------------------------------------
def init_cheb_network(key, in_channels, hidden_channels, out_channels, K):
    dims = [in_channels] + list(hidden_channels) + [out_channels]
    params = []
    for i in range(len(dims) - 1):
        f_in, f_out = dims[i], dims[i + 1]
        key, wk = jax.random.split(key)
        # glorot-style deterministic init
        scale = jnp.sqrt(6.0 / (f_in + f_out)).astype(jnp.float32)
        w = jax.random.uniform(wk, (K, f_in, f_out), jnp.float32, -scale, scale)
        b = jnp.zeros((1, f_out), jnp.float32)
        params.append((w, b))
    return params


def _pad_and_stack_params(params, f_pad):
    """Zero-pad each layer's (K,F_in,F_out) weight to (K,F_pad,F_pad), flatten the K taps
    into the contraction dim, and stack across layers."""
    w_list, b_list = [], []
    for (w, b) in params:
        K, f_in, f_out = w.shape
        w_p = jnp.zeros((K, f_pad, f_pad), jnp.float32).at[:, :f_in, :f_out].set(w)
        w_list.append(w_p.reshape(K * f_pad, f_pad))
        b_p = jnp.zeros((1, f_pad), jnp.float32).at[:, : b.shape[1]].set(b)
        b_list.append(b_p)
    return jnp.stack(w_list, axis=0), jnp.stack(b_list, axis=0)


def cheb_network_forward(params, x, edge_index, edge_weight):
    num_nodes, in_channels = x.shape
    num_layers = len(params)
    K = params[0][0].shape[0]
    out_channels = params[-1][0].shape[2]

    # Common padded feature width (lane-dense) and padded node count (sublane-aligned).
    max_feat = max([in_channels] + [w.shape[2] for (w, _) in params])
    f_pad = _round_up(max(max_feat, 128), 128)
    n_pad = _round_up(num_nodes, 8)

    lhat = build_scaled_laplacian(edge_index, edge_weight, num_nodes)
    lhat_p = jnp.zeros((n_pad, n_pad), jnp.float32).at[:num_nodes, :num_nodes].set(lhat)
    lhat_bf16 = lhat_p.astype(jnp.bfloat16)  # MXU operand; halves L_hat's VMEM footprint

    x_p = jnp.zeros((n_pad, f_pad), jnp.float32).at[:num_nodes, :in_channels].set(x)

    w_all, b_all = _pad_and_stack_params(params, f_pad)

    out_p = cheb_network_pallas(lhat_bf16, x_p, w_all, b_all, num_layers, K)
    return out_p[:num_nodes, :out_channels]


if __name__ == "__main__":
    key = jax.random.PRNGKey(0)

    # Small graph: N nodes on a ring (undirected -> both directions).
    N = 32
    in_channels = 4
    hidden_channels = [16, 8]
    out_channels = 2
    K = 3

    src = jnp.arange(N, dtype=jnp.int32)
    dst = (src + 1) % N
    edge_index = jnp.stack(
        [jnp.concatenate([src, dst]), jnp.concatenate([dst, src])], axis=0
    )  # (2, 2N)
    key, k_x, k_w, k_p = jax.random.split(key, 4)
    ew_half = jax.random.uniform(k_w, (N,), jnp.float32, 0.5, 1.5)
    edge_weight = jnp.concatenate([ew_half, ew_half])  # symmetric weights, (2N,)

    x = jax.random.normal(k_x, (N, in_channels), jnp.float32)

    params = init_cheb_network(k_p, in_channels, hidden_channels, out_channels, K)

    out = cheb_network_forward(params, x, edge_index, edge_weight)
    out = jax.block_until_ready(out)

    assert out.shape == (N, out_channels)
    assert bool(jnp.all(jnp.isfinite(out)))
    assert bool(jnp.all((out > 0.0) & (out < 1.0)))  # sigmoid output range
    print("KERNEL_OK")
</pallas_src>

<mosaic_0001>
module attributes {stable_mosaic.version = 11 : i64} {
  func.func @_cheb_network_kernel(%arg0: i32, %arg1: memref<32x32xbf16, #tpu.memory_space<vmem>>, %arg2: memref<32x128xf32, #tpu.memory_space<vmem>>, %arg3: memref<3x384x128xf32, #tpu.memory_space<vmem>>, %arg4: memref<3x1x128xf32, #tpu.memory_space<vmem>>, %arg5: memref<32x128xf32, #tpu.memory_space<vmem>>) attributes {dimension_semantics = [#tpu.dimension_semantics<arbitrary>], iteration_bounds = array<i64: 1>, scalar_prefetch = 0 : i64, scratch_operands = 0 : i64, tpu.core_type = #tpu.core_type<tc>, window_params = [{pipeline_mode = #tpu.pipeline_mode<synchronous>, transform_indices = @transform_0, window_bounds = array<i64: 32, 32>}, {pipeline_mode = #tpu.pipeline_mode<synchronous>, transform_indices = @transform_1, window_bounds = array<i64: 32, 128>}, {pipeline_mode = #tpu.pipeline_mode<synchronous>, transform_indices = @transform_2, window_bounds = array<i64: 3, 384, 128>}, {pipeline_mode = #tpu.pipeline_mode<synchronous>, transform_indices = @transform_3, window_bounds = array<i64: 3, 1, 128>}, {pipeline_mode = #tpu.pipeline_mode<synchronous>, transform_indices = @transform_4, window_bounds = array<i64: 32, 128>}]} {
    %c0 = arith.constant 0 : index
    %c0_0 = arith.constant 0 : index
    %0 = vector.load %arg1[%c0, %c0_0] : memref<32x32xbf16, #tpu.memory_space<vmem>>, vector<32x32xbf16>
    %c0_1 = arith.constant 0 : index
    %c0_2 = arith.constant 0 : index
    %1 = vector.load %arg2[%c0_1, %c0_2] : memref<32x128xf32, #tpu.memory_space<vmem>>, vector<32x128xf32>
    %2 = arith.truncf %1 : vector<32x128xf32> to vector<32x128xbf16>
    %cst = arith.constant dense<0.000000e+00> : vector<32x128xf32>
    %3 = tpu.matmul %0, %2, %cst {dimension_numbers = #tpu.dot_dimension_numbers<[1], [0], [0], [1], [0, 0, 1, 1], [], []>} : vector<32x32xbf16>, vector<32x128xbf16>, vector<32x128xf32> -> vector<32x128xf32>
    %4 = arith.truncf %3 : vector<32x128xf32> to vector<32x128xbf16>
    %cst_3 = arith.constant dense<0.000000e+00> : vector<32x128xf32>
    %5 = tpu.matmul %0, %4, %cst_3 {dimension_numbers = #tpu.dot_dimension_numbers<[1], [0], [0], [1], [0, 0, 1, 1], [], []>} : vector<32x32xbf16>, vector<32x128xbf16>, vector<32x128xf32> -> vector<32x128xf32>
    %cst_4 = arith.constant 2.000000e+00 : f32
    %6 = vector.broadcast %cst_4 : f32 to vector<32x128xf32>
    %7 = arith.mulf %6, %5 : vector<32x128xf32>
    %8 = arith.subf %7, %1 : vector<32x128xf32>
    %9 = tpu.concatenate %1, %3, %8 in 1 : vector<32x128xf32>, vector<32x128xf32>, vector<32x128xf32> -> vector<32x384xf32>
    %10 = arith.truncf %9 : vector<32x384xf32> to vector<32x384xbf16>
    %c0_5 = arith.constant 0 : index
    %c0_6 = arith.constant 0 : index
    %c0_7 = arith.constant 0 : index
    %11 = vector.load %arg3[%c0_5, %c0_6, %c0_7] : memref<3x384x128xf32, #tpu.memory_space<vmem>>, vector<1x384x128xf32>
    %12 = vector.shape_cast %11 : vector<1x384x128xf32> to vector<384x128xf32>
    %13 = arith.truncf %12 : vector<384x128xf32> to vector<384x128xbf16>
    %cst_8 = arith.constant dense<0.000000e+00> : vector<32x128xf32>
    %14 = tpu.matmul %10, %13, %cst_8 {dimension_numbers = #tpu.dot_dimension_numbers<[1], [0], [0], [1], [0, 0, 1, 1], [], []>} : vector<32x384xbf16>, vector<384x128xbf16>, vector<32x128xf32> -> vector<32x128xf32>
    %c0_9 = arith.constant 0 : index
    %c0_10 = arith.constant 0 : index
    %c0_11 = arith.constant 0 : index
    %15 = vector.load %arg4[%c0_9, %c0_10, %c0_11] : memref<3x1x128xf32, #tpu.memory_space<vmem>>, vector<1x1x128xf32>
    %16 = vector.shape_cast %15 : vector<1x1x128xf32> to vector<1x128xf32>
    %17 = vector.broadcast %16 : vector<1x128xf32> to vector<32x128xf32>
    %18 = arith.addf %14, %17 : vector<32x128xf32>
    %19 = arith.negf %18 : vector<32x128xf32>
    %20 = math.exp %19 : vector<32x128xf32>
    %cst_12 = arith.constant 1.000000e+00 : f32
    %21 = vector.broadcast %cst_12 : f32 to vector<32x128xf32>
    %22 = arith.addf %21, %20 : vector<32x128xf32>
    %23 = arith.divf %21, %22 : vector<32x128xf32>
    %24 = arith.truncf %23 : vector<32x128xf32> to vector<32x128xbf16>
    %cst_13 = arith.constant dense<0.000000e+00> : vector<32x128xf32>
    %25 = tpu.matmul %0, %24, %cst_13 {dimension_numbers = #tpu.dot_dimension_numbers<[1], [0], [0], [1], [0, 0, 1, 1], [], []>} : vector<32x32xbf16>, vector<32x128xbf16>, vector<32x128xf32> -> vector<32x128xf32>
    %26 = arith.truncf %25 : vector<32x128xf32> to vector<32x128xbf16>
    %cst_14 = arith.constant dense<0.000000e+00> : vector<32x128xf32>
    %27 = tpu.matmul %0, %26, %cst_14 {dimension_numbers = #tpu.dot_dimension_numbers<[1], [0], [0], [1], [0, 0, 1, 1], [], []>} : vector<32x32xbf16>, vector<32x128xbf16>, vector<32x128xf32> -> vector<32x128xf32>
    %cst_15 = arith.constant 2.000000e+00 : f32
    %28 = vector.broadcast %cst_15 : f32 to vector<32x128xf32>
    %29 = arith.mulf %28, %27 : vector<32x128xf32>
    %30 = arith.subf %29, %23 : vector<32x128xf32>
    %31 = tpu.concatenate %23, %25, %30 in 1 : vector<32x128xf32>, vector<32x128xf32>, vector<32x128xf32> -> vector<32x384xf32>
    %32 = arith.truncf %31 : vector<32x384xf32> to vector<32x384xbf16>
    %c1 = arith.constant 1 : index
    %c0_16 = arith.constant 0 : index
    %c0_17 = arith.constant 0 : index
    %33 = vector.load %arg3[%c1, %c0_16, %c0_17] : memref<3x384x128xf32, #tpu.memory_space<vmem>>, vector<1x384x128xf32>
    %34 = vector.shape_cast %33 : vector<1x384x128xf32> to vector<384x128xf32>
    %35 = arith.truncf %34 : vector<384x128xf32> to vector<384x128xbf16>
    %cst_18 = arith.constant dense<0.000000e+00> : vector<32x128xf32>
    %36 = tpu.matmul %32, %35, %cst_18 {dimension_numbers = #tpu.dot_dimension_numbers<[1], [0], [0], [1], [0, 0, 1, 1], [], []>} : vector<32x384xbf16>, vector<384x128xbf16>, vector<32x128xf32> -> vector<32x128xf32>
    %c1_19 = arith.constant 1 : index
    %c0_20 = arith.constant 0 : index
    %c0_21 = arith.constant 0 : index
    %37 = vector.load %arg4[%c1_19, %c0_20, %c0_21] : memref<3x1x128xf32, #tpu.memory_space<vmem>>, vector<1x1x128xf32>
    %38 = vector.shape_cast %37 : vector<1x1x128xf32> to vector<1x128xf32>
    %39 = vector.broadcast %38 : vector<1x128xf32> to vector<32x128xf32>
    %40 = arith.addf %36, %39 : vector<32x128xf32>
    %41 = arith.negf %40 : vector<32x128xf32>
    %42 = math.exp %41 : vector<32x128xf32>
    %cst_22 = arith.constant 1.000000e+00 : f32
    %43 = vector.broadcast %cst_22 : f32 to vector<32x128xf32>
    %44 = arith.addf %43, %42 : vector<32x128xf32>
    %45 = arith.divf %43, %44 : vector<32x128xf32>
    %46 = arith.truncf %45 : vector<32x128xf32> to vector<32x128xbf16>
    %cst_23 = arith.constant dense<0.000000e+00> : vector<32x128xf32>
    %47 = tpu.matmul %0, %46, %cst_23 {dimension_numbers = #tpu.dot_dimension_numbers<[1], [0], [0], [1], [0, 0, 1, 1], [], []>} : vector<32x32xbf16>, vector<32x128xbf16>, vector<32x128xf32> -> vector<32x128xf32>
    %48 = arith.truncf %47 : vector<32x128xf32> to vector<32x128xbf16>
    %cst_24 = arith.constant dense<0.000000e+00> : vector<32x128xf32>
    %49 = tpu.matmul %0, %48, %cst_24 {dimension_numbers = #tpu.dot_dimension_numbers<[1], [0], [0], [1], [0, 0, 1, 1], [], []>} : vector<32x32xbf16>, vector<32x128xbf16>, vector<32x128xf32> -> vector<32x128xf32>
    %cst_25 = arith.constant 2.000000e+00 : f32
    %50 = vector.broadcast %cst_25 : f32 to vector<32x128xf32>
    %51 = arith.mulf %50, %49 : vector<32x128xf32>
    %52 = arith.subf %51, %45 : vector<32x128xf32>
    %53 = tpu.concatenate %45, %47, %52 in 1 : vector<32x128xf32>, vector<32x128xf32>, vector<32x128xf32> -> vector<32x384xf32>
    %54 = arith.truncf %53 : vector<32x384xf32> to vector<32x384xbf16>
    %c2 = arith.constant 2 : index
    %c0_26 = arith.constant 0 : index
    %c0_27 = arith.constant 0 : index
    %55 = vector.load %arg3[%c2, %c0_26, %c0_27] : memref<3x384x128xf32, #tpu.memory_space<vmem>>, vector<1x384x128xf32>
    %56 = vector.shape_cast %55 : vector<1x384x128xf32> to vector<384x128xf32>
    %57 = arith.truncf %56 : vector<384x128xf32> to vector<384x128xbf16>
    %cst_28 = arith.constant dense<0.000000e+00> : vector<32x128xf32>
    %58 = tpu.matmul %54, %57, %cst_28 {dimension_numbers = #tpu.dot_dimension_numbers<[1], [0], [0], [1], [0, 0, 1, 1], [], []>} : vector<32x384xbf16>, vector<384x128xbf16>, vector<32x128xf32> -> vector<32x128xf32>
    %c2_29 = arith.constant 2 : index
    %c0_30 = arith.constant 0 : index
    %c0_31 = arith.constant 0 : index
    %59 = vector.load %arg4[%c2_29, %c0_30, %c0_31] : memref<3x1x128xf32, #tpu.memory_space<vmem>>, vector<1x1x128xf32>
    %60 = vector.shape_cast %59 : vector<1x1x128xf32> to vector<1x128xf32>
    %61 = vector.broadcast %60 : vector<1x128xf32> to vector<32x128xf32>
    %62 = arith.addf %58, %61 : vector<32x128xf32>
    %63 = arith.negf %62 : vector<32x128xf32>
    %64 = math.exp %63 : vector<32x128xf32>
    %cst_32 = arith.constant 1.000000e+00 : f32
    %65 = vector.broadcast %cst_32 : f32 to vector<32x128xf32>
    %66 = arith.addf %65, %64 : vector<32x128xf32>
    %67 = arith.divf %65, %66 : vector<32x128xf32>
    %c0_33 = arith.constant 0 : index
    %c0_34 = arith.constant 0 : index
    %68 = vector.load %arg5[%c0_33, %c0_34] : memref<32x128xf32, #tpu.memory_space<vmem>>, vector<32x128xf32>
    tpu.vector_store %arg5[%c0_33, %c0_34], %67 {strides = array<i32>} : memref<32x128xf32, #tpu.memory_space<vmem>>, vector<32x128xf32>,
    return
  }
  func.func @transform_0(%arg0: i32) -> (i32, i32) {
    %c0_i32 = arith.constant 0 : i32
    %c0_i32_0 = arith.constant 0 : i32
    %c0_i32_1 = arith.constant 0 : i32
    return %c0_i32, %c0_i32_0 : i32, i32
  }
  func.func @transform_1(%arg0: i32) -> (i32, i32) {
    %c0_i32 = arith.constant 0 : i32
    %c0_i32_0 = arith.constant 0 : i32
    %c0_i32_1 = arith.constant 0 : i32
    return %c0_i32, %c0_i32_0 : i32, i32
  }
  func.func @transform_2(%arg0: i32) -> (i32, i32, i32) {
    %c0_i32 = arith.constant 0 : i32
    %c0_i32_0 = arith.constant 0 : i32
    %c0_i32_1 = arith.constant 0 : i32
    %c0_i32_2 = arith.constant 0 : i32
    return %c0_i32, %c0_i32_0, %c0_i32_1 : i32, i32, i32
  }
  func.func @transform_3(%arg0: i32) -> (i32, i32, i32) {
    %c0_i32 = arith.constant 0 : i32
    %c0_i32_0 = arith.constant 0 : i32
    %c0_i32_1 = arith.constant 0 : i32
    %c0_i32_2 = arith.constant 0 : i32
    return %c0_i32, %c0_i32_0, %c0_i32_1 : i32, i32, i32
  }
  func.func @transform_4(%arg0: i32) -> (i32, i32) {
    %c0_i32 = arith.constant 0 : i32
    %c0_i32_0 = arith.constant 0 : i32
    %c0_i32_1 = arith.constant 0 : i32
    return %c0_i32, %c0_i32_0 : i32, i32
  }
}

</mosaic_0001>

<bundles_post_ra>
// kernel: tpu_custom_call.1
= control target key start
LH: loop header
LB: loop body
LE: loop exit
PB: predicated region body
PF: predicated region fallthrough
CT: control target
= control target key end

     0   :  { %9 = vsyncpa [#allocation3], 0  ;;  %s1640_s0 = inlined_call_operand.hbm [shape: bf16[32,32], index: 0, kind: input, shape index: {}]   ;;  %s1641_s1 = inlined_call_operand.hbm [shape: f32[32,128], index: 1, kind: input, shape index: {}]   ;;  %s1642_s2 = inlined_call_operand.hbm [shape: f32[3,384,128], index: 2, kind: input, shape index: {}]   ;;  %s1643_s3 = inlined_call_operand.vmem [shape: f32[3,1,128], index: 3, kind: input, shape index: {}]   ;;  %s1644_s4 = inlined_call_operand.hbm [shape: f32[32,128], index: 4, kind: output, shape index: {}]  }
   0x1   :  { %10 = vsyncpa [#allocation6], 0 }
   0x2   :  { %11 = vsyncpa [#allocation4], 0  ;;  %s1471_s15 = smov [#allocation5]  }
   0x3   :  { %s29_s16 = sshll.u32 %s1471_s15, 4  ;;  %s30_s16 = int_to_ptr.vmem [resolvable:$true] %s29_s16 }
   0x4   :  { %s1393_s17 = scalar_lea.vmem %s30_s16, 512  ;;  %p1398_p1 = scmp.lt.s32.totalorder %s30_s16, %s30_s16 }
   0x5   :  { %p1394_p0 = scmp.ne.s32.totalorder %s30_s16, %s1393_s17  ;;  %p1399_p2 = scmp.lt.s32.totalorder %s1393_s17, %s1393_s17 }
   0x7   :  { %p1400_p3 = por %p1399_p2, %p1398_p1 }
   0x9   :  { %p1401_p4 = pnand %p1400_p3, %p1394_p0 }
   0xb   :  { %1404 = shalt.err (!%p1401_p4)
}
   0xc   :  { %s1472_s18 = smov 128   ;;  %s1473_s19 = smov 8  }
   0xd   :  { %35 = dma.hbm_to_vmem [thread:$0]  %s1641_s1, 512, %s30_s16, [#allocation6], %s1472_s18, %s1472_s18, %s1473_s19  }
   0xe   :  { %s1474_s22 = smov [#allocation2]  }
   0xf   :  { %s17_s23 = sshll.u32 %s1474_s22, 4  ;;  %s18_s23 = int_to_ptr.vmem [resolvable:$true] %s17_s23 }
  0x10   :  { %s1413_s24 = scalar_lea.vmem %s18_s23, 256  ;;  %p1418_p6 = scmp.lt.s32.totalorder %s18_s23, %s18_s23 }
  0x11   :  { %p1414_p5 = scmp.ne.s32.totalorder %s18_s23, %s1413_s24  ;;  %p1419_p7 = scmp.lt.s32.totalorder %s1413_s24, %s1413_s24 }
  0x13   :  { %p1420_p8 = por %p1419_p7, %p1418_p6 }
  0x15   :  { %p1421_p9 = pnand %p1420_p8, %p1414_p5 }
  0x17   :  { %1424 = shalt.err (!%p1421_p9)
}
  0x18   :  { %s1475_s25 = smov 64   ;;  %s1476_s26 = smov 4  }
  0x19   :  { %23 = dma.hbm_to_vmem [thread:$0]  %s1640_s0, 256, %s18_s23, [#allocation3], %s1475_s25, %s1475_s25, %s1476_s26  }
  0x1a   :  { %s1477_s29 = smov [#allocation7]  }
  0x1b   :  { %s41_s30 = sshll.u32 %s1477_s29, 4  ;;  %s42_s30 = int_to_ptr.vmem [resolvable:$true] %s41_s30 }
  0x1c   :  { %s1433_s1 = scalar_lea.vmem %s42_s30, 18432  ;;  %p1438_p11 = scmp.lt.s32.totalorder %s42_s30, %s42_s30 }
  0x1d   :  { %p1434_p10 = scmp.ne.s32.totalorder %s42_s30, %s1433_s1  ;;  %p1439_p12 = scmp.lt.s32.totalorder %s1433_s1, %s1433_s1 }
  0x1f   :  { %p1440_p13 = por %p1439_p12, %p1438_p11 }
  0x21   :  { %p1441_p0 = pnand %p1440_p13, %p1434_p10 }
  0x23   :  { %1444 = shalt.err (!%p1441_p0)
}
  0x24   :  { %47 = dma.hbm_to_vmem [thread:$0]  %s1642_s2, 18432, %s42_s30, [#allocation6], %s1472_s18, %s1472_s18, %s1473_s19  }
  0x25   :  { %1465 = dma.done.wait [#allocation3], 256  }
  0x26   :  { %1466 = vsyncadd [#allocation3], 4294967040 }
  0x27   :  { %1467 = dma.done.wait [#allocation6], 18944  }
  0x28   :  { %1468 = vsyncadd [#allocation6], 4294948352  ;;  %v1519_v0 = vld [vmem:[#allocation5 + $0x10] sm:$0xff]  ;;  %v1521_v1 = vld [vmem:[#allocation5 + $0x18] sm:$0xff]  ;;  %vm80_vm0 = vcmask 261120  }
  0x29   :  { %v1523_v2 = vld [vmem:[#allocation5] sm:$0xff]  ;;  %v1527_v3 = vpack.c.bf16 %v1521_v1, %v1519_v0  ;;  %v1529_v4 = vld [vmem:[#allocation5 + $0x8] sm:$0xff]  ;;  %v1535_v6 = vld [vmem:[#allocation2] sm:$0xff]  }
  0x2a   :  { %v1533_v5 = vpack.c.bf16 %v1529_v4, %v1523_v2  ;;  %v227_v7 = vld [vmem:[#allocation7 + $0xf0] sm:$0xff]  ;;  %v228_v8 = vld [vmem:[#allocation7 + $0xf8] sm:$0xff]  ;;  %1223 = vmatprep.mubr.msk.bf16.mxu0 %vm80_vm0, %v1535_v6  ;;  %1231 = vmatprep.mubr.msk.bf16.mxu1 %vm80_vm0, %v1535_v6  ;;  %v225_v12 = vld [vmem:[#allocation7 + $0xe0] sm:$0xff] }
  0x2b   :  { %1219 = vmatprep.subr.bf16.mxu0 %v1527_v3  ;;  %v260_v9 = vpack.c.bf16 %v228_v8, %v227_v7  ;;  %v211_v10 = vld [vmem:[#allocation7 + $0x70] sm:$0xff]  ;;  %v212_v11 = vld [vmem:[#allocation7 + $0x78] sm:$0xff]  ;;  %v226_v13 = vld [vmem:[#allocation7 + $0xe8] sm:$0xff] }
  0x2c   :  { %1220 = vmatpush3.bf16.msra.mxu0 %v1527_v3  ;;  %v1544_v14 = vld [vmem:[#allocation2 + $0x8] sm:$0xff]   ;;  %v252_v15 = vpack.c.bf16 %v212_v11, %v211_v10  ;;  %v259_v16 = vpack.c.bf16 %v226_v13, %v225_v12  ;;  %v209_v17 = vld [vmem:[#allocation7 + $0x60] sm:$0xff]  ;;  %v210_v18 = vld [vmem:[#allocation7 + $0x68] sm:$0xff] }
  0x2d   :  { %1221 = vmatprep.subr.bf16.mxu0 %v1533_v5  ;;  %v223_v19 = vld [vmem:[#allocation7 + $0xd0] sm:$0xff]  ;;  %v224_v20 = vld [vmem:[#allocation7 + $0xd8] sm:$0xff]  ;;  %v251_v21 = vpack.c.bf16 %v210_v18, %v209_v17  ;;  %v221_v25 = vld [vmem:[#allocation7 + $0xc0] sm:$0xff] }
  0x2e   :  { %v258_v22 = vpack.c.bf16 %v224_v20, %v223_v19  ;;  %v207_v23 = vld [vmem:[#allocation7 + $0x50] sm:$0xff]  ;;  %v208_v24 = vld [vmem:[#allocation7 + $0x58] sm:$0xff]  ;;  %v222_v26 = vld [vmem:[#allocation7 + $0xc8] sm:$0xff] }
  0x2f   :  { %v250_v27 = vpack.c.bf16 %v208_v24, %v207_v23  ;;  %v257_v28 = vpack.c.bf16 %v222_v26, %v221_v25  ;;  %v205_v29 = vld [vmem:[#allocation7 + $0x40] sm:$0xff]  ;;  %v206_v30 = vld [vmem:[#allocation7 + $0x48] sm:$0xff]  ;;  %v219_v31 = vld [vmem:[#allocation7 + $0xb0] sm:$0xff] }
  0x30   :  { %1222 = vmatpush3.bf16.msra.mxu0 %v1533_v5  ;;  %v220_v32 = vld [vmem:[#allocation7 + $0xb8] sm:$0xff]  ;;  %v249_v33 = vpack.c.bf16 %v206_v30, %v205_v29  ;;  %v203_v35 = vld [vmem:[#allocation7 + $0x30] sm:$0xff]  ;;  %v217_v37 = vld [vmem:[#allocation7 + $0xa0] sm:$0xff] }
  0x31   :  { %1089 = vmatprep.subr.bf16.mxu0 %v260_v9  ;;  %v256_v34 = vpack.c.bf16 %v220_v32, %v219_v31  ;;  %v204_v36 = vld [vmem:[#allocation7 + $0x38] sm:$0xff]  ;;  %v218_v38 = vld [vmem:[#allocation7 + $0xa8] sm:$0xff]  ;;  %v201_v41 = vld [vmem:[#allocation7 + $0x20] sm:$0xff] }
  0x32   :  { %v248_v39 = vpack.c.bf16 %v204_v36, %v203_v35  ;;  %v255_v40 = vpack.c.bf16 %v218_v38, %v217_v37  ;;  %v202_v42 = vld [vmem:[#allocation7 + $0x28] sm:$0xff]  ;;  %v215_v44 = vld [vmem:[#allocation7 + $0x90] sm:$0xff]  ;;  %v216_v45 = vld [vmem:[#allocation7 + $0x98] sm:$0xff] }
  0x33   :  { %1224 = vmatmul.mubr.msk.bf16.vlgmr.msra.gmra.mxu0 %vm80_vm0, %v1544_v14  ;;  %v247_v43 = vpack.c.bf16 %v202_v42, %v201_v41  ;;  %v254_v46 = vpack.c.bf16 %v216_v45, %v215_v44  ;;  %v199_v47 = vld [vmem:[#allocation7 + $0x10] sm:$0xff]  ;;  %v200_v48 = vld [vmem:[#allocation7 + $0x18] sm:$0xff]  ;;  %v213_v50 = vld [vmem:[#allocation7 + $0x80] sm:$0xff] }
  0x34   :  { %1090 = vmatpush3.bf16.msra.mxu0 %v252_v15  ;;  %v246_v49 = vpack.c.bf16 %v200_v48, %v199_v47  ;;  %v214_v51 = vld [vmem:[#allocation7 + $0x88] sm:$0xff]  ;;  %v197_v53 = vld [vmem:[#allocation7] sm:$0xff]  ;;  %v243_v61 = vld [vmem:[#allocation7 + $0x170] sm:$0xff] }
  0x35   :  { %1091 = vmatprep.subr.bf16.mxu0 %v259_v16  ;;  %v253_v52 = vpack.c.bf16 %v214_v51, %v213_v50  ;;  %v198_v54 = vld [vmem:[#allocation7 + $0x8] sm:$0xff]  ;;  %v244_v62 = vld [vmem:[#allocation7 + $0x178] sm:$0xff]  ;;  %v241_v8 = vld [vmem:[#allocation7 + $0x160] sm:$0xff] }
  0x36   :  { %v245_v55 = vpack.c.bf16 %v198_v54, %v197_v53  ;;  %v268_v7 = vpack.c.bf16 %v244_v62, %v243_v61  ;;  %v242_v9 = vld [vmem:[#allocation7 + $0x168] sm:$0xff]  ;;  %v239_v11 = vld [vmem:[#allocation7 + $0x150] sm:$0xff]  ;;  %v240_v12 = vld [vmem:[#allocation7 + $0x158] sm:$0xff] }
  0x37   :  { %v267_v10 = vpack.c.bf16 %v242_v9, %v241_v8  ;;  %v266_v13 = vpack.c.bf16 %v240_v12, %v239_v11  ;;  %v237_v15 = vld [vmem:[#allocation7 + $0x140] sm:$0xff]  ;;  %v238_v16 = vld [vmem:[#allocation7 + $0x148] sm:$0xff]  ;;  %v235_v17 = vld [vmem:[#allocation7 + $0x130] sm:$0xff] }
  0x38   :  { %1092 = vmatpush3.bf16.msra.mxu0 %v251_v21  ;;  %v236_v18 = vld [vmem:[#allocation7 + $0x138] sm:$0xff]  ;;  %v233_v20 = vld [vmem:[#allocation7 + $0x120] sm:$0xff]  ;;  %v234_v21 = vld [vmem:[#allocation7 + $0x128] sm:$0xff] }
  0x39   :  { %1093 = vmatprep.subr.bf16.mxu0 %v258_v22  ;;  %v264_v19 = vpack.c.bf16 %v236_v18, %v235_v17  ;;  %v263_v22 = vpack.c.bf16 %v234_v21, %v233_v20  ;;  %v232_v23 = vld [vmem:[#allocation7 + $0x118] sm:$0xff]  ;;  %v229_v25 = vld [vmem:[#allocation7 + $0x100] sm:$0xff]  ;;  %v230_v26 = vld [vmem:[#allocation7 + $0x108] sm:$0xff] }
  0x3c   :  { %1094 = vmatpush3.bf16.msra.mxu0 %v250_v27  ;;  %v261_v27 = vpack.c.bf16 %v230_v26, %v229_v25  ;;  %v525_v26 = vld [vmem:[#allocation7 + $0x1f0] sm:$0xff] }
  0x3d   :  { %1095 = vmatprep.subr.bf16.mxu0 %v257_v28 }
  0x40   :  { %1096 = vmatpush3.bf16.msra.mxu0 %v249_v33 }
  0x41   :  { %1097 = vmatprep.subr.bf16.mxu0 %v256_v34 }
  0x44   :  { %1098 = vmatpush3.bf16.msra.mxu0 %v248_v39 }
  0x45   :  { %1099 = vmatprep.subr.bf16.mxu0 %v255_v40 }
  0x48   :  { %1100 = vmatpush3.bf16.msra.mxu0 %v247_v43 }
  0x49   :  { %1101 = vmatprep.subr.bf16.mxu0 %v254_v46 }
  0x4c   :  { %1102 = vmatpush3.bf16.msra.mxu0 %v246_v49 }
  0x4d   :  { %1103 = vmatprep.subr.bf16.mxu0 %v253_v52 }
  0x50   :  { %1104 = vmatpush3.bf16.msra.mxu0 %v245_v55 }
  0xf3   :  { %v1225_v56 = vpop.f32.mrf.mxu0 }
  0xf5   :  { %v121_v57 = vpop.f32.mrf.mxu0 }
  0xf7   :  { %v1226_v58 = vpop.f32.mrf.mxu0 }
  0xf8   :  { %v137_v59 = vpack.c.bf16 %v1226_v58, %v1225_v56 }
  0xf9   :  { %v124_v60 = vpop.f32.mrf.mxu0 }
  0xfa   :  { %v136_v63 = vpack.c.bf16 %v124_v60, %v121_v57  ;;  %1227 = vmatprep.subr.bf16.mxu1 %v137_v59 }
  0xfb   :  { %1228 = vmatpush3.bf16.msra.mxu1 %v137_v59 }
  0xfc   :  { %1229 = vmatprep.subr.bf16.mxu1 %v136_v63  ;;  %308 = vmatprep.mubr.bf16.mxu0 %v136_v63 }
  0xfd   :  { %309 = vmatmul.mubr.bf16.vlgmr.msra.gmra.mxu0 %v1533_v5  ;;  %v265_v5 = vpack.c.bf16 %v238_v16, %v237_v15 }
  0xfe   :  { %316 = vmatprep.mubr.bf16.mxu0 %v137_v59 }
  0xff   :  { %1230 = vmatpush3.bf16.msra.mxu1 %v136_v63 }
 0x100   :  { %1235 = vmatprep.subr.bf16.mxu1 %v268_v7 }
 0x102   :  { %1232 = vmatmul.mubr.msk.bf16.vlgmr.msra.gmra.mxu1 %vm80_vm0, %v1544_v14 }
 0x103   :  { %1236 = vmatpush3.bf16.msra.mxu1 %v268_v7 }
 0x104   :  { %1237 = vmatprep.subr.bf16.mxu1 %v267_v10 }
 0x105   :  { %317 = vmatmul.mubr.bf16.gmra.mxu0 %v1527_v3  ;;  %v231_v3 = vld [vmem:[#allocation7 + $0x110] sm:$0xff] }
 0x106   :  { %1267 = vmatprep.mubr.msk.bf16.mxu0 %vm80_vm0, %v1535_v6  ;;  %v262_v24 = vpack.c.bf16 %v232_v23, %v231_v3  ;;  %v541_v3 = vld [vmem:[#allocation7 + $0x270] sm:$0xff]  ;;  %v542_v23 = vld [vmem:[#allocation7 + $0x278] sm:$0xff] }
 0x107   :  { %1238 = vmatpush3.bf16.msra.mxu1 %v267_v10  ;;  %v574_v25 = vpack.c.bf16 %v542_v23, %v541_v3  ;;  %v555_v23 = vld [vmem:[#allocation7 + $0x2e0] sm:$0xff] }
 0x108   :  { %1239 = vmatprep.subr.bf16.mxu1 %v266_v13 }
 0x10b   :  { %1240 = vmatpush3.bf16.msra.mxu1 %v266_v13 }
 0x10c   :  { %1241 = vmatprep.subr.bf16.mxu1 %v265_v5 }
 0x10f   :  { %1242 = vmatpush3.bf16.msra.mxu1 %v265_v5 }
 0x110   :  { %1243 = vmatprep.subr.bf16.mxu1 %v264_v19 }
 0x113   :  { %1244 = vmatpush3.bf16.msra.mxu1 %v264_v19 }
 0x114   :  { %1245 = vmatprep.subr.bf16.mxu1 %v263_v22 }
 0x117   :  { %1246 = vmatpush3.bf16.msra.mxu1 %v263_v22 }
 0x118   :  { %1247 = vmatprep.subr.bf16.mxu1 %v262_v24 }
 0x11b   :  { %1248 = vmatpush3.bf16.msra.mxu1 %v262_v24 }
 0x11c   :  { %1249 = vmatprep.subr.bf16.mxu1 %v261_v27 }
 0x11f   :  { %1250 = vmatpush3.bf16.msra.mxu1 %v261_v27  ;;  %v526_v27 = vld [vmem:[#allocation7 + $0x1f8] sm:$0xff] }
 0x1bd   :  { %v1105_v42 = vpop.f32.mrf.mxu0 }
 0x1bf   :  { %v1106_v43 = vpop.f32.mrf.mxu0 }
 0x1c0   :  { %v1107_v49 = vadd.f32 %v1106_v43, %v1105_v42 }
 0x1c1   :  { %v1108_v44 = vpop.f32.mrf.mxu0 }
 0x1c2   :  { %v1233_v28 = vpop.f32.mrf.mxu1 }
 0x1c3   :  { %v189_v33 = vmul.f32 2.0, %v1233_v28  ;;  %v1109_v45 = vpop.f32.mrf.mxu0  ;;  %v539_v28 = vld [vmem:[#allocation7 + $0x260] sm:$0xff] }
 0x1c4   :  { %v172_v29 = vpop.f32.mrf.mxu1  ;;  %v1110_v52 = vadd.f32 %v1109_v45, %v1108_v44  ;;  %v519_v44 = vld [vmem:[#allocation7 + $0x1c0] sm:$0xff]  ;;  %v520_v45 = vld [vmem:[#allocation7 + $0x1c8] sm:$0xff] }
 0x1c5   :  { %v187_v31 = vmul.f32 2.0, %v172_v29  ;;  %v193_v39 = vsub.f32 %v189_v33, %v1519_v0  ;;  %v1111_v46 = vpop.f32.mrf.mxu0  ;;  %v1056_v0 = vld [vmem:[%s1643_s3] ss:$0 sm:$0xff]  ;;  %v540_v29 = vld [vmem:[#allocation7 + $0x268] sm:$0xff] }
 0x1c6   :  { %v1234_v30 = vpop.f32.mrf.mxu1  ;;  %v311_v54 = vadd.f32 %v1107_v49, %v1056_v0  ;;  %v314_v62 = vadd.f32 %v1110_v52, %v1056_v0  ;;  %v524_v33 = vld [vmem:[#allocation7 + $0x1e8] sm:$0xff]  ;;  %v518_v49 = vld [vmem:[#allocation7 + $0x1b8] sm:$0xff]  ;;  %v515_v52 = vld [vmem:[#allocation7 + $0x1a0] sm:$0xff] }
 0x1c7   :  { %v190_v32 = vmul.f32 2.0, %v1234_v30  ;;  %v191_v37 = vsub.f32 %v187_v31, %v1523_v2  ;;  %v1112_v47 = vpop.f32.mrf.mxu0  ;;  %v566_v30 = vpack.c.bf16 %v526_v27, %v525_v26  ;;  %v573_v31 = vpack.c.bf16 %v540_v29, %v539_v28  ;;  %v553_v27 = vld [vmem:[#allocation7 + $0x2d0] sm:$0xff]  ;;  %v554_v28 = vld [vmem:[#allocation7 + $0x2d8] sm:$0xff] }
 0x1c8   :  { %v175_v34 = vpop.f32.mrf.mxu1  ;;  %v1113_v48 = vadd.f32 %v1112_v47, %v1111_v46  ;;  %v533_v46 = vld [vmem:[#allocation7 + $0x230] sm:$0xff]  ;;  %v534_v47 = vld [vmem:[#allocation7 + $0x238] sm:$0xff]  ;;  %v580_v29 = vpack.c.bf16 %v554_v28, %v553_v27 }
 0x1c9   :  { %v188_v35 = vmul.f32 2.0, %v175_v34  ;;  %v194_v36 = vsub.f32 %v190_v32, %v1521_v1  ;;  %v1114_v1 = vpop.f32.mrf.mxu0  ;;  %v523_v32 = vld [vmem:[#allocation7 + $0x1e0] sm:$0xff]  ;;  %v537_v34 = vld [vmem:[#allocation7 + $0x250] sm:$0xff] }
 0x1ca   :  { %v319_v50 = vadd.f32 %v1113_v48, %v1056_v0  ;;  %v570_v48 = vpack.c.bf16 %v534_v47, %v533_v46 }
 0x1cb   :  { %v192_v38 = vsub.f32 %v188_v35, %v1529_v4  ;;  %v196_v41 = vpack.c.bf16 %v194_v36, %v193_v39  ;;  %v1115_v2 = vpop.f32.mrf.mxu0  ;;  %v538_v35 = vld [vmem:[#allocation7 + $0x258] sm:$0xff]  ;;  %v565_v36 = vpack.c.bf16 %v524_v33, %v523_v32  ;;  %v549_v32 = vld [vmem:[#allocation7 + $0x2b0] sm:$0xff] }
 0x1cc   :  { %v1116_v4 = vadd.f32 %v1115_v2, %v1114_v1  ;;  %v522_v39 = vld [vmem:[#allocation7 + $0x1d8] sm:$0xff]  ;;  %v563_v1 = vpack.c.bf16 %v520_v45, %v519_v44  ;;  %v517_v2 = vld [vmem:[#allocation7 + $0x1b0] sm:$0xff] }
 0x1cd   :  { %v195_v40 = vpack.c.bf16 %v192_v38, %v191_v37  ;;  %v572_v37 = vpack.c.bf16 %v538_v35, %v537_v34  ;;  %v521_v38 = vld [vmem:[#allocation7 + $0x1d0] sm:$0xff]  ;;  %v550_v33 = vld [vmem:[#allocation7 + $0x2b8] sm:$0xff]  ;;  %v547_v35 = vld [vmem:[#allocation7 + $0x2a0] sm:$0xff] }
 0x1ce   :  { %v322_v58 = vadd.f32 %v1116_v4, %v1056_v0  ;;  %v564_v42 = vpack.c.bf16 %v522_v39, %v521_v38  ;;  %v531_v0 = vld [vmem:[#allocation7 + $0x220] sm:$0xff]  ;;  %v532_v4 = vld [vmem:[#allocation7 + $0x228] sm:$0xff]  ;;  %v578_v34 = vpack.c.bf16 %v550_v33, %v549_v32  ;;  %v546_v38 = vld [vmem:[#allocation7 + $0x298] sm:$0xff] }
 0x1cf   :  { %1251 = vmatprep.mubr.bf16.mxu1 %v195_v40  ;;  %v535_v40 = vld [vmem:[#allocation7 + $0x240] sm:$0xff] }
 0x1d0   :  { %1252 = vmatmul.mubr.bf16.vlgmr.msra.gmra.mxu1 %v196_v41  ;;  %v536_v41 = vld [vmem:[#allocation7 + $0x248] sm:$0xff] }
 0x1d1   :  { %1259 = vmatprep.mubr.msk.bf16.mxu1 %vm80_vm0, %v1535_v6  ;;  %v571_v43 = vpack.c.bf16 %v536_v41, %v535_v40  ;;  %v543_v40 = vld [vmem:[#allocation7 + $0x280] sm:$0xff]  ;;  %v544_v41 = vld [vmem:[#allocation7 + $0x288] sm:$0xff] }
 0x290   :  { %v1253_v51 = vpop.f32.mrf.mxu1 }
 0x291   :  { %v368_v53 = vadd.f32 %v1253_v51, %v319_v50  ;;  %v562_v50 = vpack.c.bf16 %v518_v49, %v517_v2  ;;  %v569_v51 = vpack.c.bf16 %v532_v4, %v531_v0 }
 0x292   :  { %v359_v55 = vpop.f32.mrf.mxu1 }
 0x293   :  { %v1059_v56 = vmul.f32 -1.442695, %v368_v53  ;;  %v360_v57 = vadd.f32 %v359_v55, %v311_v54  ;;  %v516_v53 = vld [vmem:[#allocation7 + $0x1a8] sm:$0xff]  ;;  %v529_v55 = vld [vmem:[#allocation7 + $0x210] sm:$0xff] }
 0x294   :  { %v1254_v59 = vpop.f32.mrf.mxu1  ;;  %v561_v54 = vpack.c.bf16 %v516_v53, %v515_v52 }
 0x295   :  { %1337 = vpow2.f32 %v1059_v56  ;;  %v1057_v60 = vmul.f32 -1.442695, %v360_v57  ;;  %v371_v61 = vadd.f32 %v1254_v59, %v322_v58  ;;  %v530_v56 = vld [vmem:[#allocation7 + $0x218] sm:$0xff]  ;;  %v513_v58 = vld [vmem:[#allocation7 + $0x190] sm:$0xff] }
 0x296   :  { %v362_v63 = vpop.f32.mrf.mxu1  ;;  %v568_v57 = vpack.c.bf16 %v530_v56, %v529_v55  ;;  %v514_v59 = vld [vmem:[#allocation7 + $0x198] sm:$0xff] }
 0x297   :  { %1339 = vpow2.f32 %v1057_v60  ;;  %v1060_v7 = vmul.f32 -1.442695, %v371_v61  ;;  %v363_v8 = vadd.f32 %v362_v63, %v314_v62  ;;  %v560_v60 = vpack.c.bf16 %v514_v59, %v513_v58  ;;  %v527_v61 = vld [vmem:[#allocation7 + $0x200] sm:$0xff]  ;;  %v528_v62 = vld [vmem:[#allocation7 + $0x208] sm:$0xff] }
 0x298   :  { %v567_v63 = vpack.c.bf16 %v528_v62, %v527_v61 }
 0x299   :  { %1341 = vpow2.f32 %v1060_v7  ;;  %v1058_v9 = vmul.f32 -1.442695, %v363_v8  ;;  %v511_v7 = vld [vmem:[#allocation7 + $0x180] sm:$0xff]  ;;  %v512_v8 = vld [vmem:[#allocation7 + $0x188] sm:$0xff] }
 0x29b   :  { %1343 = vpow2.f32 %v1058_v9  ;;  %v559_v9 = vpack.c.bf16 %v512_v8, %v511_v7 }
 0x2a2   :  { %v1338_v10 = vpop.eup %1337 }
 0x2a3   :  { %v388_v12 = vadd.f32 1.0, %v1338_v10 }
 0x2a4   :  { %v1340_v11 = vpop.eup %1339 }
 0x2a5   :  { %v386_v15 = vadd.f32 1.0, %v1340_v11  ;;  %1345 = vrcp.f32 %v388_v12 }
 0x2a6   :  { %v1342_v13 = vpop.eup %1341 }
 0x2a7   :  { %v389_v16 = vadd.f32 1.0, %v1342_v13 }
 0x2a8   :  { %v1344_v5 = vpop.eup %1343 }
 0x2a9   :  { %1347 = vrcp.f32 %v389_v16  ;;  %v387_v17 = vadd.f32 1.0, %v1344_v5  ;;  %v557_v16 = vld [vmem:[#allocation7 + $0x2f0] sm:$0xff]  ;;  %v558_v5 = vld [vmem:[#allocation7 + $0x2f8] sm:$0xff] }
 0x2aa   :  { %1349 = vrcp.f32 %v386_v15  ;;  %v582_v3 = vpack.c.bf16 %v558_v5, %v557_v16 }
 0x2ab   :  { %1351 = vrcp.f32 %v387_v17 }
 0x2b2   :  { %v1564_v18 = vpop.eup %1345 }
 0x2b6   :  { %v1566_v19 = vpop.eup %1347 }
 0x2b7   :  { %v1568_v20 = vpop.eup %1349  ;;  %v1572_v21 = vpack.c.bf16 %v1566_v19, %v1564_v18 }
 0x2b8   :  { %v1574_v22 = vpop.eup %1351 }
 0x2b9   :  { %1255 = vmatprep.subr.bf16.mxu1 %v1572_v21  ;;  %v1579_v24 = vpack.c.bf16 %v1574_v22, %v1568_v20 }
 0x2ba   :  { %1256 = vmatpush3.bf16.msra.mxu1 %v1572_v21 }
 0x2bb   :  { %1257 = vmatprep.subr.bf16.mxu1 %v1579_v24 }
 0x2be   :  { %1258 = vmatpush3.bf16.msra.mxu1 %v1579_v24 }
 0x2bf   :  { %1135 = vmatprep.subr.bf16.mxu1 %v574_v25  ;;  %v556_v25 = vld [vmem:[#allocation7 + $0x2e8] sm:$0xff] }
 0x2c0   :  { %v581_v26 = vpack.c.bf16 %v556_v25, %v555_v23 }
 0x2c1   :  { %1260 = vmatmul.mubr.msk.bf16.vlgmr.msra.gmra.mxu1 %vm80_vm0, %v1544_v14 }
 0x2c2   :  { %1136 = vmatpush3.bf16.msra.mxu1 %v566_v30  ;;  %v551_v30 = vld [vmem:[#allocation7 + $0x2c0] sm:$0xff] }
 0x2c3   :  { %1137 = vmatprep.subr.bf16.mxu1 %v573_v31  ;;  %v552_v31 = vld [vmem:[#allocation7 + $0x2c8] sm:$0xff] }
 0x2c6   :  { %1138 = vmatpush3.bf16.msra.mxu1 %v565_v36  ;;  %v548_v36 = vld [vmem:[#allocation7 + $0x2a8] sm:$0xff] }
 0x2c7   :  { %1139 = vmatprep.subr.bf16.mxu1 %v572_v37  ;;  %v577_v37 = vpack.c.bf16 %v548_v36, %v547_v35 }
 0x2ca   :  { %1140 = vmatpush3.bf16.msra.mxu1 %v564_v42  ;;  %v575_v42 = vpack.c.bf16 %v544_v41, %v543_v40  ;;  %v840_v40 = vld [vmem:[#allocation7 + $0x370] sm:$0xff]  ;;  %v841_v41 = vld [vmem:[#allocation7 + $0x378] sm:$0xff] }
 0x2cb   :  { %1141 = vmatprep.subr.bf16.mxu1 %v571_v43 }
 0x2ce   :  { %1142 = vmatpush3.bf16.msra.mxu1 %v563_v1 }
 0x2cf   :  { %1143 = vmatprep.subr.bf16.mxu1 %v570_v48 }
 0x2d2   :  { %1144 = vmatpush3.bf16.msra.mxu1 %v562_v50 }
 0x2d3   :  { %1145 = vmatprep.subr.bf16.mxu1 %v569_v51 }
 0x2d6   :  { %1146 = vmatpush3.bf16.msra.mxu1 %v561_v54 }
 0x2d7   :  { %1147 = vmatprep.subr.bf16.mxu1 %v568_v57 }
 0x2da   :  { %1148 = vmatpush3.bf16.msra.mxu1 %v560_v60 }
 0x2db   :  { %1149 = vmatprep.subr.bf16.mxu1 %v567_v63 }
 0x2de   :  { %1150 = vmatpush3.bf16.msra.mxu1 %v559_v9 }
 0x381   :  { %v1261_v10 = vpop.f32.mrf.mxu1 }
 0x383   :  { %v434_v11 = vpop.f32.mrf.mxu1 }
 0x385   :  { %v1262_v12 = vpop.f32.mrf.mxu1 }
 0x386   :  { %v450_v13 = vpack.c.bf16 %v1262_v12, %v1261_v10 }
 0x387   :  { %v437_v15 = vpop.f32.mrf.mxu1 }
 0x388   :  { %v449_v17 = vpack.c.bf16 %v437_v15, %v434_v11  ;;  %1263 = vmatprep.subr.bf16.mxu0 %v450_v13 }
 0x389   :  { %1264 = vmatpush3.bf16.msra.mxu0 %v450_v13 }
 0x38a   :  { %1265 = vmatprep.subr.bf16.mxu0 %v449_v17  ;;  %623 = vmatprep.mubr.bf16.mxu1 %v449_v17 }
 0x38b   :  { %624 = vmatmul.mubr.bf16.vlgmr.msra.gmra.mxu1 %v1579_v24  ;;  %v579_v24 = vpack.c.bf16 %v552_v31, %v551_v30 }
 0x38c   :  { %631 = vmatprep.mubr.bf16.mxu1 %v450_v13 }
 0x38d   :  { %1266 = vmatpush3.bf16.msra.mxu0 %v449_v17 }
 0x38e   :  { %1271 = vmatprep.subr.bf16.mxu0 %v582_v3 }
 0x390   :  { %1268 = vmatmul.mubr.msk.bf16.vlgmr.msra.gmra.mxu0 %vm80_vm0, %v1544_v14 }
 0x391   :  { %1272 = vmatpush3.bf16.msra.mxu0 %v582_v3 }
 0x392   :  { %1273 = vmatprep.subr.bf16.mxu0 %v581_v26 }
 0x393   :  { %632 = vmatmul.mubr.bf16.gmra.mxu1 %v1572_v21  ;;  %v545_v21 = vld [vmem:[#allocation7 + $0x290] sm:$0xff] }
 0x394   :  { %1303 = vmatprep.mubr.msk.bf16.mxu1 %vm80_vm0, %v1535_v6  ;;  %v576_v39 = vpack.c.bf16 %v546_v38, %v545_v21  ;;  %v857_v21 = vld [vmem:[#allocation7 + $0x3f8] sm:$0xff] }
 0x395   :  { %1274 = vmatpush3.bf16.msra.mxu0 %v581_v26 }
 0x396   :  { %1275 = vmatprep.subr.bf16.mxu0 %v580_v29 }
 0x399   :  { %1276 = vmatpush3.bf16.msra.mxu0 %v580_v29 }
 0x39a   :  { %1277 = vmatprep.subr.bf16.mxu0 %v579_v24 }
 0x39d   :  { %1278 = vmatpush3.bf16.msra.mxu0 %v579_v24 }
 0x39e   :  { %1279 = vmatprep.subr.bf16.mxu0 %v578_v34 }
 0x3a1   :  { %1280 = vmatpush3.bf16.msra.mxu0 %v578_v34 }
 0x3a2   :  { %1281 = vmatprep.subr.bf16.mxu0 %v577_v37 }
 0x3a5   :  { %1282 = vmatpush3.bf16.msra.mxu0 %v577_v37  ;;  %v856_v37 = vld [vmem:[#allocation7 + $0x3f0] sm:$0xff] }
 0x3a6   :  { %1283 = vmatprep.subr.bf16.mxu0 %v576_v39 }
 0x3a9   :  { %1284 = vmatpush3.bf16.msra.mxu0 %v576_v39  ;;  %v889_v39 = vpack.c.bf16 %v857_v21, %v856_v37  ;;  %v870_v37 = vld [vmem:[#allocation7 + $0x460] sm:$0xff]  ;;  %v871_v21 = vld [vmem:[#allocation7 + $0x468] sm:$0xff] }
 0x3aa   :  { %1285 = vmatprep.subr.bf16.mxu0 %v575_v42 }
 0x3ad   :  { %1286 = vmatpush3.bf16.msra.mxu0 %v575_v42  ;;  %v854_v42 = vld [vmem:[#allocation7 + $0x3e0] sm:$0xff] }
 0x44b   :  { %v1151_v53 = vpop.f32.mrf.mxu1 }
 0x44d   :  { %v1152_v54 = vpop.f32.mrf.mxu1 }
 0x44e   :  { %v1153_v60 = vadd.f32 %v1152_v54, %v1151_v53  ;;  %v834_v54 = vld [vmem:[#allocation7 + $0x340] sm:$0xff] }
 0x44f   :  { %v1154_v55 = vpop.f32.mrf.mxu1 }
 0x450   :  { %v1269_v43 = vpop.f32.mrf.mxu0 }
 0x451   :  { %v502_v1 = vmul.f32 2.0, %v1269_v43  ;;  %v1155_v56 = vpop.f32.mrf.mxu1  ;;  %v855_v43 = vld [vmem:[#allocation7 + $0x3e8] sm:$0xff] }
 0x452   :  { %v485_v44 = vpop.f32.mrf.mxu0  ;;  %v1156_v63 = vadd.f32 %v1155_v56, %v1154_v55  ;;  %v835_v55 = vld [vmem:[#allocation7 + $0x348] sm:$0xff]  ;;  %v848_v56 = vld [vmem:[#allocation7 + $0x3b0] sm:$0xff] }
 0x453   :  { %v500_v46 = vmul.f32 2.0, %v485_v44  ;;  %v506_v50 = vsub.f32 %v502_v1, %v1564_v18  ;;  %v1157_v57 = vpop.f32.mrf.mxu1  ;;  %v1066_v18 = vld [vmem:[%s1643_s3 + $0x1] ss:$0 sm:$0xff]  ;;  %v881_v44 = vpack.c.bf16 %v841_v41, %v840_v40  ;;  %v869_v41 = vld [vmem:[#allocation7 + $0x458] sm:$0xff] }
 0x454   :  { %v1270_v45 = vpop.f32.mrf.mxu0  ;;  %v629_v16 = vadd.f32 %v1156_v63, %v1066_v18  ;;  %v852_v1 = vld [vmem:[#allocation7 + $0x3d0] sm:$0xff]  ;;  %v831_v63 = vld [vmem:[#allocation7 + $0x328] sm:$0xff] }
 0x455   :  { %v503_v47 = vmul.f32 2.0, %v1270_v45  ;;  %v504_v0 = vsub.f32 %v500_v46, %v1568_v20  ;;  %v1158_v58 = vpop.f32.mrf.mxu1  ;;  %v888_v45 = vpack.c.bf16 %v855_v43, %v854_v42  ;;  %v838_v46 = vld [vmem:[#allocation7 + $0x360] sm:$0xff]  ;;  %v868_v40 = vld [vmem:[#allocation7 + $0x450] sm:$0xff] }
 0x456   :  { %v488_v48 = vpop.f32.mrf.mxu0  ;;  %v1159_v59 = vadd.f32 %v1158_v58, %v1157_v57  ;;  %v849_v57 = vld [vmem:[#allocation7 + $0x3b8] sm:$0xff]  ;;  %v878_v58 = vpack.c.bf16 %v835_v55, %v834_v54  ;;  %v895_v42 = vpack.c.bf16 %v869_v41, %v868_v40  ;;  %v866_v43 = vld [vmem:[#allocation7 + $0x440] sm:$0xff] }
 0x457   :  { %v501_v2 = vmul.f32 2.0, %v488_v48  ;;  %v507_v49 = vsub.f32 %v503_v47, %v1566_v19  ;;  %v1160_v19 = vpop.f32.mrf.mxu1  ;;  %v839_v47 = vld [vmem:[#allocation7 + $0x368] sm:$0xff]  ;;  %v853_v48 = vld [vmem:[#allocation7 + $0x3d8] sm:$0xff] }
 0x458   :  { %v634_v61 = vadd.f32 %v1159_v59, %v1066_v18  ;;  %v832_v59 = vld [vmem:[#allocation7 + $0x330] sm:$0xff] }
 0x459   :  { %v505_v4 = vsub.f32 %v501_v2, %v1574_v22  ;;  %v509_v52 = vpack.c.bf16 %v507_v49, %v506_v50  ;;  %v1161_v20 = vpop.f32.mrf.mxu1  ;;  %v880_v2 = vpack.c.bf16 %v839_v47, %v838_v46  ;;  %v887_v49 = vpack.c.bf16 %v853_v48, %v852_v1  ;;  %v850_v50 = vld [vmem:[#allocation7 + $0x3c0] sm:$0xff]  ;;  %v865_v46 = vld [vmem:[#allocation7 + $0x438] sm:$0xff] }
 0x45a   :  { %v1162_v22 = vadd.f32 %v1161_v20, %v1160_v19  ;;  %v885_v19 = vpack.c.bf16 %v849_v57, %v848_v56  ;;  %v833_v20 = vld [vmem:[#allocation7 + $0x338] sm:$0xff]  ;;  %v862_v1 = vld [vmem:[#allocation7 + $0x420] sm:$0xff] }
 0x45b   :  { %v508_v51 = vpack.c.bf16 %v505_v4, %v504_v0  ;;  %v836_v0 = vld [vmem:[#allocation7 + $0x350] sm:$0xff]  ;;  %v837_v4 = vld [vmem:[#allocation7 + $0x358] sm:$0xff] }
 0x45c   :  { %v637_v11 = vadd.f32 %v1162_v22, %v1066_v18  ;;  %v877_v22 = vpack.c.bf16 %v833_v20, %v832_v59 }
 0x45d   :  { %1287 = vmatprep.mubr.bf16.mxu0 %v508_v51  ;;  %v851_v51 = vld [vmem:[#allocation7 + $0x3c8] sm:$0xff] }
 0x45e   :  { %1288 = vmatmul.mubr.bf16.vlgmr.msra.gmra.mxu0 %v509_v52  ;;  %v879_v52 = vpack.c.bf16 %v837_v4, %v836_v0  ;;  %v886_v53 = vpack.c.bf16 %v851_v51, %v850_v50  ;;  %v858_v0 = vld [vmem:[#allocation7 + $0x400] sm:$0xff]  ;;  %v859_v4 = vld [vmem:[#allocation7 + $0x408] sm:$0xff] }
 0x45f   :  { %1295 = vmatprep.mubr.msk.bf16.mxu0 %vm80_vm0, %v1535_v6  ;;  %v626_v6 = vadd.f32 %v1153_v60, %v1066_v18  ;;  %v846_v60 = vld [vmem:[#allocation7 + $0x3a0] sm:$0xff]  ;;  %v847_v18 = vld [vmem:[#allocation7 + $0x3a8] sm:$0xff]  ;;  %v890_v50 = vpack.c.bf16 %v859_v4, %v858_v0 }
 0x51e   :  { %v1289_v62 = vpop.f32.mrf.mxu0 }
 0x51f   :  { %v683_v7 = vadd.f32 %v1289_v62, %v634_v61  ;;  %v884_v61 = vpack.c.bf16 %v847_v18, %v846_v60  ;;  %v830_v62 = vld [vmem:[#allocation7 + $0x320] sm:$0xff] }
 0x520   :  { %v674_v8 = vpop.f32.mrf.mxu0 }
 0x521   :  { %v1069_v9 = vmul.f32 -1.442695, %v683_v7  ;;  %v675_v10 = vadd.f32 %v674_v8, %v626_v6  ;;  %v876_v7 = vpack.c.bf16 %v831_v63, %v830_v62  ;;  %v844_v6 = vld [vmem:[#allocation7 + $0x390] sm:$0xff]  ;;  %v845_v8 = vld [vmem:[#allocation7 + $0x398] sm:$0xff] }
 0x522   :  { %v1290_v12 = vpop.f32.mrf.mxu0 }
 0x523   :  { %1353 = vpow2.f32 %v1069_v9  ;;  %v1067_v13 = vmul.f32 -1.442695, %v675_v10  ;;  %v686_v15 = vadd.f32 %v1290_v12, %v637_v11  ;;  %v883_v9 = vpack.c.bf16 %v845_v8, %v844_v6  ;;  %v828_v10 = vld [vmem:[#allocation7 + $0x310] sm:$0xff]  ;;  %v829_v11 = vld [vmem:[#allocation7 + $0x318] sm:$0xff] }
 0x524   :  { %v677_v5 = vpop.f32.mrf.mxu0  ;;  %v875_v12 = vpack.c.bf16 %v829_v11, %v828_v10 }
 0x525   :  { %1355 = vpow2.f32 %v1067_v13  ;;  %v1070_v17 = vmul.f32 -1.442695, %v686_v15  ;;  %v678_v3 = vadd.f32 %v677_v5, %v629_v16  ;;  %v842_v13 = vld [vmem:[#allocation7 + $0x380] sm:$0xff]  ;;  %v843_v15 = vld [vmem:[#allocation7 + $0x388] sm:$0xff] }
 0x526   :  { %v882_v16 = vpack.c.bf16 %v843_v15, %v842_v13  ;;  %v826_v5 = vld [vmem:[#allocation7 + $0x300] sm:$0xff] }
 0x527   :  { %1357 = vpow2.f32 %v1070_v17  ;;  %v1068_v23 = vmul.f32 -1.442695, %v678_v3  ;;  %v827_v17 = vld [vmem:[#allocation7 + $0x308] sm:$0xff] }
 0x528   :  { %v874_v3 = vpack.c.bf16 %v827_v17, %v826_v5 }
 0x529   :  { %1359 = vpow2.f32 %v1068_v23 }
 0x530   :  { %v1354_v25 = vpop.eup %1353 }
 0x531   :  { %v703_v27 = vadd.f32 1.0, %v1354_v25 }
 0x532   :  { %v1356_v26 = vpop.eup %1355 }
 0x533   :  { %v701_v29 = vadd.f32 1.0, %v1356_v26  ;;  %1361 = vrcp.f32 %v703_v27 }
 0x534   :  { %v1358_v28 = vpop.eup %1357 }
 0x535   :  { %v704_v30 = vadd.f32 1.0, %v1358_v28 }
 0x536   :  { %v1360_v31 = vpop.eup %1359 }
 0x537   :  { %1363 = vrcp.f32 %v704_v30  ;;  %v702_v24 = vadd.f32 1.0, %v1360_v31  ;;  %v873_v30 = vld [vmem:[#allocation7 + $0x478] sm:$0xff] }
 0x538   :  { %1365 = vrcp.f32 %v701_v29  ;;  %v872_v29 = vld [vmem:[#allocation7 + $0x470] sm:$0xff] }
 0x539   :  { %1367 = vrcp.f32 %v702_v24  ;;  %v897_v24 = vpack.c.bf16 %v873_v30, %v872_v29 }
 0x540   :  { %v1601_v32 = vpop.eup %1361 }
 0x544   :  { %v1603_v33 = vpop.eup %1363 }
 0x545   :  { %v1605_v34 = vpop.eup %1365  ;;  %v1609_v35 = vpack.c.bf16 %v1603_v33, %v1601_v32 }
 0x546   :  { %v1611_v36 = vpop.eup %1367 }
 0x547   :  { %1291 = vmatprep.subr.bf16.mxu0 %v1609_v35  ;;  %v1616_v38 = vpack.c.bf16 %v1611_v36, %v1605_v34 }
 0x548   :  { %1292 = vmatpush3.bf16.msra.mxu0 %v1609_v35 }
 0x549   :  { %1293 = vmatprep.subr.bf16.mxu0 %v1616_v38 }
 0x54c   :  { %1294 = vmatpush3.bf16.msra.mxu0 %v1616_v38 }
 0x54d   :  { %1181 = vmatprep.subr.bf16.mxu0 %v889_v39  ;;  %v896_v39 = vpack.c.bf16 %v871_v21, %v870_v37 }
 0x54f   :  { %1296 = vmatmul.mubr.msk.bf16.vlgmr.msra.gmra.mxu0 %vm80_vm0, %v1544_v14 }
 0x550   :  { %1182 = vmatpush3.bf16.msra.mxu0 %v881_v44  ;;  %v867_v44 = vld [vmem:[#allocation7 + $0x448] sm:$0xff] }
 0x551   :  { %1183 = vmatprep.subr.bf16.mxu0 %v888_v45  ;;  %v864_v45 = vld [vmem:[#allocation7 + $0x430] sm:$0xff] }
 0x552   :  { %v893_v47 = vpack.c.bf16 %v865_v46, %v864_v45 }
 0x554   :  { %1184 = vmatpush3.bf16.msra.mxu0 %v880_v2  ;;  %v860_v2 = vld [vmem:[#allocation7 + $0x410] sm:$0xff] }
 0x555   :  { %1185 = vmatprep.subr.bf16.mxu0 %v887_v49 }
 0x558   :  { %1186 = vmatpush3.bf16.msra.mxu0 %v879_v52 }
 0x559   :  { %1187 = vmatprep.subr.bf16.mxu0 %v886_v53 }
 0x55c   :  { %1188 = vmatpush3.bf16.msra.mxu0 %v878_v58 }
 0x55d   :  { %1189 = vmatprep.subr.bf16.mxu0 %v885_v19 }
 0x560   :  { %1190 = vmatpush3.bf16.msra.mxu0 %v877_v22 }
 0x561   :  { %1191 = vmatprep.subr.bf16.mxu0 %v884_v61 }
 0x564   :  { %1192 = vmatpush3.bf16.msra.mxu0 %v876_v7 }
 0x565   :  { %1193 = vmatprep.subr.bf16.mxu0 %v883_v9 }
 0x568   :  { %1194 = vmatpush3.bf16.msra.mxu0 %v875_v12 }
 0x569   :  { %1195 = vmatprep.subr.bf16.mxu0 %v882_v16 }
 0x56c   :  { %1196 = vmatpush3.bf16.msra.mxu0 %v874_v3 }
 0x60f   :  { %v1297_v23 = vpop.f32.mrf.mxu0 }
 0x611   :  { %v749_v25 = vpop.f32.mrf.mxu0 }
 0x613   :  { %v1298_v26 = vpop.f32.mrf.mxu0 }
 0x614   :  { %v765_v27 = vpack.c.bf16 %v1298_v26, %v1297_v23 }
 0x615   :  { %v752_v28 = vpop.f32.mrf.mxu0 }
 0x616   :  { %v764_v31 = vpack.c.bf16 %v752_v28, %v749_v25  ;;  %1299 = vmatprep.subr.bf16.mxu1 %v765_v27 }
 0x617   :  { %1300 = vmatpush3.bf16.msra.mxu1 %v765_v27 }
 0x618   :  { %1301 = vmatprep.subr.bf16.mxu1 %v764_v31  ;;  %938 = vmatprep.mubr.bf16.mxu0 %v764_v31 }
 0x619   :  { %939 = vmatmul.mubr.bf16.vlgmr.msra.gmra.mxu0 %v1616_v38  ;;  %v894_v38 = vpack.c.bf16 %v867_v44, %v866_v43 }
 0x61a   :  { %946 = vmatprep.mubr.bf16.mxu0 %v765_v27 }
 0x61b   :  { %1302 = vmatpush3.bf16.msra.mxu1 %v764_v31 }
 0x61c   :  { %1307 = vmatprep.subr.bf16.mxu1 %v897_v24 }
 0x61e   :  { %1304 = vmatmul.mubr.msk.bf16.vlgmr.msra.gmra.mxu1 %vm80_vm0, %v1544_v14  ;;  %v863_v14 = vld [vmem:[#allocation7 + $0x428] sm:$0xff] }
 0x61f   :  { %1308 = vmatpush3.bf16.msra.mxu1 %v897_v24  ;;  %v892_v48 = vpack.c.bf16 %v863_v14, %v862_v1 }
 0x620   :  { %1309 = vmatprep.subr.bf16.mxu1 %v896_v39 }
 0x621   :  { %947 = vmatmul.mubr.bf16.gmra.mxu0 %v1609_v35  ;;  %v861_v35 = vld [vmem:[#allocation7 + $0x418] sm:$0xff] }
 0x622   :  { %v891_v49 = vpack.c.bf16 %v861_v35, %v860_v2 }
 0x623   :  { %1310 = vmatpush3.bf16.msra.mxu1 %v896_v39 }
 0x624   :  { %1311 = vmatprep.subr.bf16.mxu1 %v895_v42 }
 0x627   :  { %1312 = vmatpush3.bf16.msra.mxu1 %v895_v42 }
 0x628   :  { %1313 = vmatprep.subr.bf16.mxu1 %v894_v38 }
 0x62b   :  { %1314 = vmatpush3.bf16.msra.mxu1 %v894_v38 }
 0x62c   :  { %1315 = vmatprep.subr.bf16.mxu1 %v893_v47 }
 0x62f   :  { %1316 = vmatpush3.bf16.msra.mxu1 %v893_v47 }
 0x630   :  { %1317 = vmatprep.subr.bf16.mxu1 %v892_v48 }
 0x633   :  { %1318 = vmatpush3.bf16.msra.mxu1 %v892_v48 }
 0x634   :  { %1319 = vmatprep.subr.bf16.mxu1 %v891_v49 }
 0x637   :  { %1320 = vmatpush3.bf16.msra.mxu1 %v891_v49 }
 0x638   :  { %1321 = vmatprep.subr.bf16.mxu1 %v890_v50 }
 0x63b   :  { %1322 = vmatpush3.bf16.msra.mxu1 %v890_v50 }
 0x6d9   :  { %v1197_v61 = vpop.f32.mrf.mxu0 }
 0x6db   :  { %v1198_v62 = vpop.f32.mrf.mxu0 }
 0x6dd   :  { %v1200_v63 = vpop.f32.mrf.mxu0 }
 0x6de   :  { %v1305_v51 = vpop.f32.mrf.mxu1 }
 0x6df   :  { %v817_v56 = vmul.f32 2.0, %v1305_v51  ;;  %v1201_v7 = vpop.f32.mrf.mxu0 }
 0x6e0   :  { %v800_v52 = vpop.f32.mrf.mxu1  ;;  %v1202_v13 = vadd.f32 %v1201_v7, %v1200_v63 }
 0x6e1   :  { %v815_v54 = vmul.f32 2.0, %v800_v52  ;;  %v821_v60 = vsub.f32 %v817_v56, %v1601_v32  ;;  %v1203_v6 = vpop.f32.mrf.mxu0 }
 0x6e2   :  { %v1306_v53 = vpop.f32.mrf.mxu1 }
 0x6e3   :  { %v818_v55 = vmul.f32 2.0, %v1306_v53  ;;  %v819_v59 = vsub.f32 %v815_v54, %v1605_v34  ;;  %v1204_v8 = vpop.f32.mrf.mxu0  ;;  %v1076_v34 = vld [vmem:[%s1643_s3 + $0x2] ss:$0 sm:$0xff]  ;;  %s1478_s3 = smov [#allocation8]  }
 0x6e4   :  { %v803_v57 = vpop.f32.mrf.mxu1  ;;  %v1205_v10 = vadd.f32 %v1204_v8, %v1203_v6  ;;  %v944_v28 = vadd.f32 %v1202_v13, %v1076_v34  ;;  %s1037_s11 = sshll.u32 %s1478_s3, 4  ;;  %s1038_s11 = int_to_ptr.vmem [resolvable:$true] %s1037_s11 }
 0x6e5   :  { %v816_v58 = vmul.f32 2.0, %v803_v57  ;;  %v822_v19 = vsub.f32 %v818_v55, %v1603_v33  ;;  %v1206_v9 = vpop.f32.mrf.mxu0  ;;  %v1199_v33 = vadd.f32 %v1198_v62, %v1197_v61  ;;  %s1445_s12 = scalar_lea.vmem %s1038_s11, 512  ;;  %p1450_p2 = scmp.lt.s32.totalorder %s1038_s11, %s1038_s11 }
 0x6e6   :  { %v949_v32 = vadd.f32 %v1205_v10, %v1076_v34  ;;  %p1446_p1 = scmp.ne.s32.totalorder %s1038_s11, %s1445_s12  ;;  %p1451_p3 = scmp.lt.s32.totalorder %s1445_s12, %s1445_s12 }
 0x6e7   :  { %v820_v20 = vsub.f32 %v816_v58, %v1611_v36  ;;  %v824_v22 = vpack.c.bf16 %v822_v19, %v821_v60  ;;  %v1207_v11 = vpop.f32.mrf.mxu0  ;;  %v941_v16 = vadd.f32 %v1199_v33, %v1076_v34 }
 0x6e8   :  { %v1208_v36 = vadd.f32 %v1207_v11, %v1206_v9  ;;  %p1452_p4 = por %p1451_p3, %p1450_p2 }
 0x6e9   :  { %v823_v18 = vpack.c.bf16 %v820_v20, %v819_v59 }
 0x6ea   :  { %v952_v23 = vadd.f32 %v1208_v36, %v1076_v34  ;;  %p1453_p5 = pnand %p1452_p4, %p1446_p1 }
 0x6eb   :  { %1323 = vmatprep.mubr.bf16.mxu1 %v823_v18 }
 0x6ec   :  { %1324 = vmatmul.mubr.bf16.vlgmr.msra.gmra.mxu1 %v824_v22 }
 0x7ac   :  { %v1325_v12 = vpop.f32.mrf.mxu1 }
 0x7ad   :  { %v998_v15 = vadd.f32 %v1325_v12, %v949_v32 }
 0x7ae   :  { %v989_v5 = vpop.f32.mrf.mxu1 }
 0x7af   :  { %v1079_v17 = vmul.f32 -1.442695, %v998_v15  ;;  %v990_v3 = vadd.f32 %v989_v5, %v941_v16 }
 0x7b0   :  { %v1326_v25 = vpop.f32.mrf.mxu1 }
 0x7b1   :  { %1369 = vpow2.f32 %v1079_v17  ;;  %v1077_v26 = vmul.f32 -1.442695, %v990_v3  ;;  %v1001_v27 = vadd.f32 %v1326_v25, %v952_v23 }
 0x7b2   :  { %v992_v29 = vpop.f32.mrf.mxu1 }
 0x7b3   :  { %1371 = vpow2.f32 %v1077_v26  ;;  %v1080_v30 = vmul.f32 -1.442695, %v1001_v27  ;;  %v993_v31 = vadd.f32 %v992_v29, %v944_v28 }
 0x7b5   :  { %1373 = vpow2.f32 %v1080_v30  ;;  %v1078_v24 = vmul.f32 -1.442695, %v993_v31 }
 0x7b7   :  { %1375 = vpow2.f32 %v1078_v24 }
 0x7be   :  { %v1370_v37 = vpop.eup %1369 }
 0x7bf   :  { %v1018_v21 = vadd.f32 1.0, %v1370_v37 }
 0x7c0   :  { %v1372_v39 = vpop.eup %1371 }
 0x7c1   :  { %1377 = vrcp.f32 %v1018_v21  ;;  %v1016_v40 = vadd.f32 1.0, %v1372_v39 }
 0x7c2   :  { %v1374_v41 = vpop.eup %1373 }
 0x7c3   :  { %1379 = vrcp.f32 %v1016_v40  ;;  %v1019_v42 = vadd.f32 1.0, %v1374_v41 }
 0x7c4   :  { %v1376_v43 = vpop.eup %1375 }
 0x7c5   :  { %1381 = vrcp.f32 %v1019_v42  ;;  %v1017_v44 = vadd.f32 1.0, %v1376_v43 }
 0x7c7   :  { %1383 = vrcp.f32 %v1017_v44 }
 0x7ce   :  { %v1378_v38 = vpop.eup %1377 }
 0x7cf   :  { %1030 = vst [vmem:[#allocation8 + $0x10] sm:$0xff] %v1378_v38 }
 0x7d0   :  { %v1380_v45 = vpop.eup %1379 }
 0x7d1   :  { %1028 = vst [vmem:[#allocation8] sm:$0xff] %v1380_v45 }
 0x7d2   :  { %v1382_v46 = vpop.eup %1381 }
 0x7d3   :  { %1031 = vst [vmem:[#allocation8 + $0x18] sm:$0xff] %v1382_v46 }
 0x7d4   :  { %v1384_v47 = vpop.eup %1383 }
 0x7d5   :  { %1029 = vst [vmem:[#allocation8 + $0x8] sm:$0xff] %v1384_v47 }
 0x7d6   :  { %1456 = shalt.err (!%p1453_p5)
}
 0x7d7   :  { %1043 = dma.vmem_to_hbm [thread:$0]  %s1038_s11, 512, %s1644_s4, [#allocation4], %s1472_s18, %s1472_s18, %s1473_s19  }
 0x7d8   :  { %1469 = dma.done.wait [#allocation4], 512  }
 0x7d9   :  { %1470 = vsyncadd [#allocation4], 4294966784 }
 0x7da   :  { %1047 = vsyncpa [#allocation3], 1 }
 0x7db   :  { %1048 = vsyncpa [#allocation6], 1 }
 0x7dc   :  { %1049 = vsyncpa [#allocation4], 1 }

</bundles_post_ra>
